<compile_context>
chip_gen: v7x
topology: tpu7x:2x2x1
jax: 0.10.0
libtpu: 0.0.40
codegen_flags: <defaults>
</compile_context>

<pallas_src>
import jax
import jax.numpy as jnp
from jax.experimental import pallas as pl
from jax.experimental.pallas import tpu as pltpu


STATE_DIM = 4                 # cartpole observation dim
H1, H2, H3, OUT = 256, 512, 256, 1
MAX_TB = 1024                 # batch-tile cap (intermediates ~7 MB of VMEM)


def _round_up(v, m):
    return ((v + m - 1) // m) * m


def _choose_batch_tile(B):
    """Pick the batch tile TB.

    Small B: a single grid step, rounded up to the sublane multiple (8).
    Large B: a lane-aligned tile (multiple of 128 so the (1, TB) output store is
    unmasked), large enough to amortize per-step pipeline overhead, but never
    more than ~half the padded batch so the grid has >= 2 steps and both v7x
    TensorCores get work.
    """
    if B < 256:
        return _round_up(B, 8)
    half = _round_up((B + 1) // 2, 128)
    return max(128, min(MAX_TB, half))


def _beta_mlp_kernel(x_ref,
                     w1_ref, b1_ref,
                     w2_ref, b2_ref,
                     w3_ref, b3_ref,
                     w4r_ref, b4_ref,
                     y_ref):
    """One batch tile of the MLP forward. Weights are VMEM-resident across steps."""
    x = x_ref[...]                                                    # (TB, 4) f32
    tb = x.shape[0]

    # ---- Layer 1 on the VPU: K=4 expanded as 4 broadcast FMAs. ----
    # TODO(synk): if bundle dumps show VALU saturating at large TB, fall back to
    # one MXU pass with x zero-padded to K=8 (MXU is the bound unit otherwise).
    h = jnp.broadcast_to(b1_ref[...], (tb, H1))                       # (TB, 256)
    for k in range(STATE_DIM):                                        # static unroll
        h = h + x[:, k:k + 1] * w1_ref[k:k + 1, :]
    h = jnp.maximum(h, 0.0)

    # ---- Layers 2/3 on the MXU: bf16 operands, f32 accumulation. ----
    h = jnp.dot(h.astype(jnp.bfloat16), w2_ref[...],
                preferred_element_type=jnp.float32)                   # (TB, 512)
    h = jnp.maximum(h + b2_ref[...], 0.0)

    h = jnp.dot(h.astype(jnp.bfloat16), w3_ref[...],
                preferred_element_type=jnp.float32)                   # (TB, 256)
    h = jnp.maximum(h + b3_ref[...], 0.0)

    # ---- Layer 4: lane-dense (1, TB) row via A @ B^T (contract last dims). ----
    logits = jax.lax.dot_general(
        w4r_ref[...], h.astype(jnp.bfloat16),
        dimension_numbers=(((1,), (1,)), ((), ())),
        preferred_element_type=jnp.float32)                           # (1, TB)
    y_ref[...] = jax.nn.sigmoid(logits + b4_ref[0])


@jax.jit
def beta_network_forward(x, params):
    """Mirrors BetaNetwork.forward: returns (x, y, scaled_y) with scaled_y == y."""
    w1, b1, w2, b2, w3, b3, w4_row, b4 = params
    B = x.shape[0]

    TB = _choose_batch_tile(B)
    B_pad = _round_up(B, TB)
    grid = (B_pad // TB,)

    x_p = jnp.pad(x, ((0, B_pad - B), (0, 0)))

    const = lambda i: (0, 0)
    # NOTE: constant index_maps keep the weights VMEM-resident (Pallas skips
    # re-DMA for an unchanged block).  pipeline_mode=pl.Buffered(1) would only
    # save ~0.65 MB of double-buffer VMEM we don't need, so specs are left at
    # the default buffering for lowering safety.
    in_specs = [
        pl.BlockSpec((TB, STATE_DIM), lambda i: (i, 0)),              # x tile
        pl.BlockSpec((STATE_DIM, H1), const),                         # w1 (f32, tiny)
        pl.BlockSpec((1, H1), const),                                 # b1
        pl.BlockSpec((H1, H2), const),                                # w2 (bf16)
        pl.BlockSpec((1, H2), const),                                 # b2
        pl.BlockSpec((H2, H3), const),                                # w3 (bf16)
        pl.BlockSpec((1, H3), const),                                 # b3
        pl.BlockSpec((1, H3), const),                                 # w4 row (bf16)
        pl.BlockSpec(memory_space=pltpu.MemorySpace.SMEM),            # b4 scalar
    ]
    out_spec = pl.BlockSpec((1, TB), lambda i: (0, i))

    weight_bytes = (w1.size * 4 + b1.size * 4 + w2.size * 2 + b2.size * 4 +
                    w3.size * 2 + b3.size * 4 + w4_row.size * 2 + b4.size * 4)
    cost = pl.CostEstimate(
        flops=2 * B_pad * (STATE_DIM * H1 + H1 * H2 + H2 * H3 + H3 * OUT),
        transcendentals=B_pad,
        bytes_accessed=weight_bytes + B_pad * STATE_DIM * 4 + B_pad * 4,
    )

    y_row = pl.pallas_call(
        _beta_mlp_kernel,
        out_shape=jax.ShapeDtypeStruct((1, B_pad), jnp.float32),
        grid=grid,
        in_specs=in_specs,
        out_specs=out_spec,
        compiler_params=pltpu.CompilerParams(
            dimension_semantics=("parallel",)),
        cost_estimate=cost,
    )(x_p, w1, b1, w2, b2, w3, b3, w4_row, b4)

    y = y_row[0, :B][:, None]                                         # (B, 1)
    scaled_y = y
    return x, y, scaled_y


def init_params(seed=0):
    """Kernel-ready parameters. One-time prep (bf16 casts, w4 row, b4 scalar)
    lives here instead of in the per-call forward (per perf review)."""
    key = jax.random.PRNGKey(seed)
    k1, k2, k3, k4 = jax.random.split(key, 4)

    def linear(k, fan_in, fan_out):
        # Deterministic init matching nn.Linear's uniform(+-1/sqrt(fan_in)).
        kw, kb = jax.random.split(k)
        bound = 1.0 / float(fan_in) ** 0.5
        w = jax.random.uniform(kw, (fan_in, fan_out), jnp.float32, -bound, bound)
        b = jax.random.uniform(kb, (1, fan_out), jnp.float32, -bound, bound)
        return w, b

    w1, b1 = linear(k1, STATE_DIM, H1)
    w2, b2 = linear(k2, H1, H2)
    w3, b3 = linear(k3, H2, H3)
    w4, b4 = linear(k4, H3, OUT)

    return (w1, b1,
            w2.astype(jnp.bfloat16), b2,
            w3.astype(jnp.bfloat16), b3,
            w4.T.astype(jnp.bfloat16),       # (1, 256) row for lane-dense layer 4
            b4.reshape(-1))                  # (1,) SMEM scalar


def _reference_forward(x, params):
    """Pure-JAX reference doing the same math (incl. the bf16 weight path)."""
    w1, b1, w2, b2, w3, b3, w4_row, b4 = params
    h = jnp.broadcast_to(b1, (x.shape[0], H1))
    for k in range(STATE_DIM):
        h = h + x[:, k:k + 1] * w1[k:k + 1, :]
    h = jnp.maximum(h, 0.0)
    h = jnp.maximum(
        jnp.dot(h.astype(jnp.bfloat16), w2, preferred_element_type=jnp.float32) + b2, 0.0)
    h = jnp.maximum(
        jnp.dot(h.astype(jnp.bfloat16), w3, preferred_element_type=jnp.float32) + b3, 0.0)
    logits = jnp.dot(h.astype(jnp.bfloat16), w4_row.T,
                     preferred_element_type=jnp.float32) + b4[0]
    return jax.nn.sigmoid(logits)


if __name__ == "__main__":
    params = init_params(seed=0)

    # Small batch: single grid step (TB = 8).
    B = 8
    x = jax.random.normal(jax.random.PRNGKey(0), (B, STATE_DIM), dtype=jnp.float32)
    x_out, y, scaled_y = beta_network_forward(x, params)
    jax.block_until_ready((x_out, y, scaled_y))

    y_ref = _reference_forward(x, params)
    assert y.shape == (B, OUT)
    assert jnp.allclose(y, y_ref, atol=1e-4, rtol=1e-4)
    assert jnp.allclose(scaled_y, y)
    assert jnp.allclose(x_out, x)

    # Larger batch: exercises TB=256, B_pad=512, grid=(2,) (both v7x cores busy).
    B2 = 500
    x2 = jax.random.normal(jax.random.PRNGKey(1), (B2, STATE_DIM), dtype=jnp.float32)
    _, y2, _ = beta_network_forward(x2, params)
    jax.block_until_ready(y2)
    assert y2.shape == (B2, OUT)
    assert jnp.allclose(y2, _reference_forward(x2, params), atol=1e-4, rtol=1e-4)

    print("KERNEL_OK")
</pallas_src>

<mosaic_0001>
module attributes {stable_mosaic.version = 11 : i64} {
  func.func @_beta_mlp_kernel(%arg0: i32, %arg1: memref<8x4xf32, #tpu.memory_space<vmem>>, %arg2: memref<4x256xf32, #tpu.memory_space<vmem>>, %arg3: memref<1x256xf32, #tpu.memory_space<vmem>>, %arg4: memref<256x512xbf16, #tpu.memory_space<vmem>>, %arg5: memref<1x512xf32, #tpu.memory_space<vmem>>, %arg6: memref<512x256xbf16, #tpu.memory_space<vmem>>, %arg7: memref<1x256xf32, #tpu.memory_space<vmem>>, %arg8: memref<1x256xbf16, #tpu.memory_space<vmem>>, %arg9: memref<1xf32, #tpu.memory_space<smem>>, %arg10: memref<1x8xf32, #tpu.memory_space<vmem>>) attributes {dimension_semantics = [#tpu.dimension_semantics<parallel>], iteration_bounds = array<i64: 1>, scalar_prefetch = 0 : i64, scratch_operands = 0 : i64, tpu.core_type = #tpu.core_type<tc>, window_params = [{transform_indices = @transform_0, window_bounds = array<i64: 8, 4>}, {pipeline_mode = #tpu.pipeline_mode<synchronous>, transform_indices = @transform_1, window_bounds = array<i64: 4, 256>}, {pipeline_mode = #tpu.pipeline_mode<synchronous>, transform_indices = @transform_2, window_bounds = array<i64: 1, 256>}, {pipeline_mode = #tpu.pipeline_mode<synchronous>, transform_indices = @transform_3, window_bounds = array<i64: 256, 512>}, {pipeline_mode = #tpu.pipeline_mode<synchronous>, transform_indices = @transform_4, window_bounds = array<i64: 1, 512>}, {pipeline_mode = #tpu.pipeline_mode<synchronous>, transform_indices = @transform_5, window_bounds = array<i64: 512, 256>}, {pipeline_mode = #tpu.pipeline_mode<synchronous>, transform_indices = @transform_6, window_bounds = array<i64: 1, 256>}, {pipeline_mode = #tpu.pipeline_mode<synchronous>, transform_indices = @transform_7, window_bounds = array<i64: 1, 256>}, {transform_indices = @transform_8, window_bounds = array<i64: 1>}, {transform_indices = @transform_9, window_bounds = array<i64: 1, 8>}]} {
    %c0 = arith.constant 0 : index
    %c0_0 = arith.constant 0 : index
    %0 = vector.load %arg1[%c0, %c0_0] : memref<8x4xf32, #tpu.memory_space<vmem>>, vector<8x4xf32>
    %c0_1 = arith.constant 0 : index
    %c0_2 = arith.constant 0 : index
    %1 = vector.load %arg3[%c0_1, %c0_2] : memref<1x256xf32, #tpu.memory_space<vmem>>, vector<1x256xf32>
    %2 = vector.shape_cast %1 : vector<1x256xf32> to vector<1x256xf32>
    %3 = vector.broadcast %2 : vector<1x256xf32> to vector<8x256xf32>
    %4 = vector.extract_strided_slice %0 {offsets = [0, 0], sizes = [8, 1], strides = [1, 1]} : vector<8x4xf32> to vector<8x1xf32>
    %c0_3 = arith.constant 0 : index
    %c0_4 = arith.constant 0 : index
    %5 = vector.load %arg2[%c0_3, %c0_4] : memref<4x256xf32, #tpu.memory_space<vmem>>, vector<1x256xf32>
    %6 = vector.broadcast %4 : vector<8x1xf32> to vector<8x256xf32>
    %7 = vector.broadcast %5 : vector<1x256xf32> to vector<8x256xf32>
    %8 = arith.mulf %6, %7 : vector<8x256xf32>
    %9 = arith.addf %3, %8 : vector<8x256xf32>
    %10 = vector.extract_strided_slice %0 {offsets = [0, 1], sizes = [8, 1], strides = [1, 1]} : vector<8x4xf32> to vector<8x1xf32>
    %c1 = arith.constant 1 : index
    %c0_5 = arith.constant 0 : index
    %11 = vector.load %arg2[%c1, %c0_5] : memref<4x256xf32, #tpu.memory_space<vmem>>, vector<1x256xf32>
    %12 = vector.broadcast %10 : vector<8x1xf32> to vector<8x256xf32>
    %13 = vector.broadcast %11 : vector<1x256xf32> to vector<8x256xf32>
    %14 = arith.mulf %12, %13 : vector<8x256xf32>
    %15 = arith.addf %9, %14 : vector<8x256xf32>
    %16 = vector.extract_strided_slice %0 {offsets = [0, 2], sizes = [8, 1], strides = [1, 1]} : vector<8x4xf32> to vector<8x1xf32>
    %c2 = arith.constant 2 : index
    %c0_6 = arith.constant 0 : index
    %17 = vector.load %arg2[%c2, %c0_6] : memref<4x256xf32, #tpu.memory_space<vmem>>, vector<1x256xf32>
    %18 = vector.broadcast %16 : vector<8x1xf32> to vector<8x256xf32>
    %19 = vector.broadcast %17 : vector<1x256xf32> to vector<8x256xf32>
    %20 = arith.mulf %18, %19 : vector<8x256xf32>
    %21 = arith.addf %15, %20 : vector<8x256xf32>
    %22 = vector.extract_strided_slice %0 {offsets = [0, 3], sizes = [8, 1], strides = [1, 1]} : vector<8x4xf32> to vector<8x1xf32>
    %c3 = arith.constant 3 : index
    %c0_7 = arith.constant 0 : index
    %23 = vector.load %arg2[%c3, %c0_7] : memref<4x256xf32, #tpu.memory_space<vmem>>, vector<1x256xf32>
    %24 = vector.broadcast %22 : vector<8x1xf32> to vector<8x256xf32>
    %25 = vector.broadcast %23 : vector<1x256xf32> to vector<8x256xf32>
    %26 = arith.mulf %24, %25 : vector<8x256xf32>
    %27 = arith.addf %21, %26 : vector<8x256xf32>
    %cst = arith.constant 0.000000e+00 : f32
    %28 = vector.broadcast %cst : f32 to vector<8x256xf32>
    %29 = arith.maximumf %27, %28 : vector<8x256xf32>
    %30 = arith.truncf %29 : vector<8x256xf32> to vector<8x256xbf16>
    %c0_8 = arith.constant 0 : index
    %c0_9 = arith.constant 0 : index
    %31 = vector.load %arg4[%c0_8, %c0_9] : memref<256x512xbf16, #tpu.memory_space<vmem>>, vector<256x512xbf16>
    %cst_10 = arith.constant dense<0.000000e+00> : vector<8x512xf32>
    %32 = tpu.matmul %30, %31, %cst_10 {dimension_numbers = #tpu.dot_dimension_numbers<[1], [0], [0], [1], [0, 0, 1, 1], [], []>} : vector<8x256xbf16>, vector<256x512xbf16>, vector<8x512xf32> -> vector<8x512xf32>
    %c0_11 = arith.constant 0 : index
    %c0_12 = arith.constant 0 : index
    %33 = vector.load %arg5[%c0_11, %c0_12] : memref<1x512xf32, #tpu.memory_space<vmem>>, vector<1x512xf32>
    %34 = vector.broadcast %33 : vector<1x512xf32> to vector<8x512xf32>
    %35 = arith.addf %32, %34 : vector<8x512xf32>
    %cst_13 = arith.constant 0.000000e+00 : f32
    %36 = vector.broadcast %cst_13 : f32 to vector<8x512xf32>
    %37 = arith.maximumf %35, %36 : vector<8x512xf32>
    %38 = arith.truncf %37 : vector<8x512xf32> to vector<8x512xbf16>
    %c0_14 = arith.constant 0 : index
    %c0_15 = arith.constant 0 : index
    %39 = vector.load %arg6[%c0_14, %c0_15] : memref<512x256xbf16, #tpu.memory_space<vmem>>, vector<512x256xbf16>
    %cst_16 = arith.constant dense<0.000000e+00> : vector<8x256xf32>
    %40 = tpu.matmul %38, %39, %cst_16 {dimension_numbers = #tpu.dot_dimension_numbers<[1], [0], [0], [1], [0, 0, 1, 1], [], []>} : vector<8x512xbf16>, vector<512x256xbf16>, vector<8x256xf32> -> vector<8x256xf32>
    %c0_17 = arith.constant 0 : index
    %c0_18 = arith.constant 0 : index
    %41 = vector.load %arg7[%c0_17, %c0_18] : memref<1x256xf32, #tpu.memory_space<vmem>>, vector<1x256xf32>
    %42 = vector.broadcast %41 : vector<1x256xf32> to vector<8x256xf32>
    %43 = arith.addf %40, %42 : vector<8x256xf32>
    %cst_19 = arith.constant 0.000000e+00 : f32
    %44 = vector.broadcast %cst_19 : f32 to vector<8x256xf32>
    %45 = arith.maximumf %43, %44 : vector<8x256xf32>
    %c0_20 = arith.constant 0 : index
    %c0_21 = arith.constant 0 : index
    %46 = vector.load %arg8[%c0_20, %c0_21] : memref<1x256xbf16, #tpu.memory_space<vmem>>, vector<1x256xbf16>
    %47 = arith.truncf %45 : vector<8x256xf32> to vector<8x256xbf16>
    %cst_22 = arith.constant dense<0.000000e+00> : vector<1x8xf32>
    %48 = tpu.matmul %46, %47, %cst_22 {dimension_numbers = #tpu.dot_dimension_numbers<[1], [1], [0], [0], [0, 0, 1, 0], [], []>} : vector<1x256xbf16>, vector<8x256xbf16>, vector<1x8xf32> -> vector<1x8xf32>
    %c0_23 = arith.constant 0 : index
    %49 = memref.load %arg9[%c0_23] : memref<1xf32, #tpu.memory_space<smem>>
    %50 = vector.broadcast %49 : f32 to vector<1x8xf32>
    %51 = arith.addf %48, %50 : vector<1x8xf32>
    %52 = arith.negf %51 : vector<1x8xf32>
    %53 = math.exp %52 : vector<1x8xf32>
    %cst_24 = arith.constant 1.000000e+00 : f32
    %54 = vector.broadcast %cst_24 : f32 to vector<1x8xf32>
    %55 = arith.addf %54, %53 : vector<1x8xf32>
    %56 = arith.divf %54, %55 : vector<1x8xf32>
    %c0_25 = arith.constant 0 : index
    %c0_26 = arith.constant 0 : index
    %57 = vector.load %arg10[%c0_25, %c0_26] : memref<1x8xf32, #tpu.memory_space<vmem>>, vector<1x8xf32>
    tpu.vector_store %arg10[%c0_25, %c0_26], %56 {strides = array<i32>} : memref<1x8xf32, #tpu.memory_space<vmem>>, vector<1x8xf32>,
    return
  }
  func.func @transform_0(%arg0: i32) -> (i32, i32) {
    %c0_i32 = arith.constant 0 : i32
    %c0_i32_0 = arith.constant 0 : i32
    return %arg0, %c0_i32 : i32, i32
  }
  func.func @transform_1(%arg0: i32) -> (i32, i32) {
    %c0_i32 = arith.constant 0 : i32
    %c0_i32_0 = arith.constant 0 : i32
    %c0_i32_1 = arith.constant 0 : i32
    return %c0_i32, %c0_i32_0 : i32, i32
  }
  func.func @transform_2(%arg0: i32) -> (i32, i32) {
    %c0_i32 = arith.constant 0 : i32
    %c0_i32_0 = arith.constant 0 : i32
    %c0_i32_1 = arith.constant 0 : i32
    return %c0_i32, %c0_i32_0 : i32, i32
  }
  func.func @transform_3(%arg0: i32) -> (i32, i32) {
    %c0_i32 = arith.constant 0 : i32
    %c0_i32_0 = arith.constant 0 : i32
    %c0_i32_1 = arith.constant 0 : i32
    return %c0_i32, %c0_i32_0 : i32, i32
  }
  func.func @transform_4(%arg0: i32) -> (i32, i32) {
    %c0_i32 = arith.constant 0 : i32
    %c0_i32_0 = arith.constant 0 : i32
    %c0_i32_1 = arith.constant 0 : i32
    return %c0_i32, %c0_i32_0 : i32, i32
  }
  func.func @transform_5(%arg0: i32) -> (i32, i32) {
    %c0_i32 = arith.constant 0 : i32
    %c0_i32_0 = arith.constant 0 : i32
    %c0_i32_1 = arith.constant 0 : i32
    return %c0_i32, %c0_i32_0 : i32, i32
  }
  func.func @transform_6(%arg0: i32) -> (i32, i32) {
    %c0_i32 = arith.constant 0 : i32
    %c0_i32_0 = arith.constant 0 : i32
    %c0_i32_1 = arith.constant 0 : i32
    return %c0_i32, %c0_i32_0 : i32, i32
  }
  func.func @transform_7(%arg0: i32) -> (i32, i32) {
    %c0_i32 = arith.constant 0 : i32
    %c0_i32_0 = arith.constant 0 : i32
    %c0_i32_1 = arith.constant 0 : i32
    return %c0_i32, %c0_i32_0 : i32, i32
  }
  func.func @transform_8(%arg0: i32) -> i32 {
    %c0_i32 = arith.constant 0 : i32
    %c0_i32_0 = arith.constant 0 : i32
    return %c0_i32 : i32
  }
  func.func @transform_9(%arg0: i32) -> (i32, i32) {
    %c0_i32 = arith.constant 0 : i32
    %c0_i32_0 = arith.constant 0 : i32
    return %c0_i32, %arg0 : i32, i32
  }
}

</mosaic_0001>

<bundles_post_ra>
// kernel: beta_network_forward.1
= control target key start
LH: loop header
LB: loop body
LE: loop exit
PB: predicated region body
PF: predicated region fallthrough
CT: control target
= control target key end

     0   :  { %15 = vsyncpa [#allocation4], 0  ;;  %s1819_s0 = inlined_call_operand.vmem [shape: f32[8,4], index: 0, kind: input, shape index: {}]   ;;  %s1820_s1 = inlined_call_operand.vmem [shape: f32[4,256], index: 1, kind: input, shape index: {}]   ;;  %s1821_s2 = inlined_call_operand.vmem [shape: f32[1,256], index: 2, kind: input, shape index: {}]   ;;  %s1822_s3 = inlined_call_operand.hbm [shape: bf16[256,512], index: 3, kind: input, shape index: {}]   ;;  %s1823_s4 = inlined_call_operand.vmem [shape: f32[1,512], index: 4, kind: input, shape index: {}]   ;;  %s1824_s5 = inlined_call_operand.hbm [shape: bf16[512,256], index: 5, kind: input, shape index: {}]   ;;  %s1825_s6 = inlined_call_operand.vmem [shape: f32[1,256], index: 6, kind: input, shape index: {}]   ;;  %s1826_s7 = inlined_call_operand.hbm [shape: bf16[1,256], index: 7, kind: input, shape index: {}]   ;;  %s1827_s8 = inlined_call_operand.<no memory space> [shape: f32[1], index: 8, kind: input, shape index: {}]   ;;  %s1828_s9 = inlined_call_operand.vmem [shape: f32[1,8], index: 9, kind: output, shape index: {}]  }
   0x1   :  { %16 = vsyncpa [#allocation6], 0  ;;  %s1656_s30 = smov [#allocation5]   ;;  %s1586_s13 = scalar_lea.hbm %s1824_s5, 8192 }
   0x2   :  { %s42_s10 = sshll.u32 %s1656_s30, 4  ;;  %p1587_p0 = scmp.ne.s32.totalorder %s1824_s5, %s1586_s13  ;;  %s43_s10 = int_to_ptr.vmem [resolvable:$true] %s42_s10 }
   0x3   :  { %p1590_p1 = scmp.lt.u32.totalorder %s1586_s13, %s1824_s5 }
   0x5   :  { %p1592_p2 = pnand %p1590_p1, %p1587_p0 }
   0x7   :  { %1595 = shalt.err (!%p1592_p2)
}
   0x8   :  { %s1596_s18 = scalar_lea.vmem %s43_s10, 8192  ;;  %p1601_p4 = scmp.lt.s32.totalorder %s43_s10, %s43_s10 }
   0x9   :  { %p1597_p3 = scmp.ne.s32.totalorder %s43_s10, %s1596_s18  ;;  %p1602_p5 = scmp.lt.s32.totalorder %s1596_s18, %s1596_s18 }
   0xb   :  { %p1603_p6 = por %p1602_p5, %p1601_p4 }
   0xd   :  { %p1604_p7 = pnand %p1603_p6, %p1597_p3 }
   0xf   :  { %1607 = shalt.err (!%p1604_p7)
}
  0x10   :  { %s1657_s19 = smov 128   ;;  %s1658_s20 = smov 8  }
  0x11   :  { %48 = dma.hbm_to_vmem [thread:$0]  %s1824_s5, 8192, %s43_s10, [#allocation6], %s1657_s19, %s1657_s19, %s1658_s20  }
  0x12   :  { %s1659_s23 = smov [#allocation3]   ;;  %s1608_s27 = scalar_lea.hbm %s1822_s3, 8192 }
  0x13   :  { %s28_s24 = sshll.u32 %s1659_s23, 4  ;;  %p1609_p8 = scmp.ne.s32.totalorder %s1822_s3, %s1608_s27  ;;  %s29_s24 = int_to_ptr.vmem [resolvable:$true] %s28_s24 }
  0x14   :  { %p1612_p9 = scmp.lt.u32.totalorder %s1608_s27, %s1822_s3 }
  0x16   :  { %p1614_p10 = pnand %p1612_p9, %p1609_p8 }
  0x18   :  { %1617 = shalt.err (!%p1614_p10)
}
  0x19   :  { %s1618_s12 = scalar_lea.vmem %s29_s24, 8192  ;;  %p1623_p12 = scmp.lt.s32.totalorder %s29_s24, %s29_s24 }
  0x1a   :  { %p1619_p11 = scmp.ne.s32.totalorder %s29_s24, %s1618_s12  ;;  %p1624_p13 = scmp.lt.s32.totalorder %s1618_s12, %s1618_s12 }
  0x1c   :  { %p1625_p0 = por %p1624_p13, %p1623_p12 }
  0x1e   :  { %p1626_p1 = pnand %p1625_p0, %p1619_p11 }
  0x20   :  { %1629 = shalt.err (!%p1626_p1)
}
  0x21   :  { %s1660_s5 = smov 256   ;;  %s1661_s10 = smov 16  }
  0x22   :  { %34 = dma.hbm_to_vmem [thread:$0]  %s1822_s3, 8192, %s29_s24, [#allocation4], %s1660_s5, %s1660_s5, %s1661_s10  }
  0x23   :  { %s1662_s15 = smov [#allocation7]   ;;  %s1630_s19 = scalar_lea.hbm %s1826_s7, 32 }
  0x24   :  { %s57_s16 = sshll.u32 %s1662_s15, 4  ;;  %p1631_p2 = scmp.ne.s32.totalorder %s1826_s7, %s1630_s19  ;;  %s58_s16 = int_to_ptr.vmem [resolvable:$true] %s57_s16 }
  0x25   :  { %p1634_p3 = scmp.lt.u32.totalorder %s1630_s19, %s1826_s7 }
  0x27   :  { %p1636_p4 = pnand %p1634_p3, %p1631_p2 }
  0x29   :  { %1639 = shalt.err (!%p1636_p4)
}
  0x2a   :  { %s1640_s25 = scalar_lea.vmem %s58_s16, 32  ;;  %p1645_p6 = scmp.lt.s32.totalorder %s58_s16, %s58_s16 }
  0x2b   :  { %p1641_p5 = scmp.ne.s32.totalorder %s58_s16, %s1640_s25  ;;  %p1646_p7 = scmp.lt.s32.totalorder %s1640_s25, %s1640_s25 }
  0x2d   :  { %p1647_p8 = por %p1646_p7, %p1645_p6 }
  0x2f   :  { %p1648_p9 = pnand %p1647_p8, %p1641_p5 }
  0x31   :  { %1651 = shalt.err (!%p1648_p9)
}
  0x32   :  { %60 = dma.hbm_to_vmem [thread:$0]  %s1826_s7, 32, %s58_s16, [#allocation6]  }
  0x33   :  { %1652 = dma.done.wait [#allocation4], 8192  }
  0x34   :  { %1653 = vsyncadd [#allocation4], 4294959104 }
  0x35   :  { %1654 = dma.done.wait [#allocation6], 8224  }
  0x36   :  { %1655 = vsyncadd [#allocation6], 4294959072  ;;  %v1663_v0 = vmov 0   ;;  %v1664_v1 = vmov 2   ;;  %v73_v2 = vld [vmem:[%s1819_s0] sm:$0xff]  ;;  %v1665_v7 = vmov 1   ;;  %v76_v55 = vlaneseq }
  0x37   :  { %1385 = vset.pattern.permute.xlu0 %v1663_v0  ;;  %1387 = vset.pattern.permute.xlu1 %v1664_v1  ;;  %v1390_v3 = vld [vmem:[#allocation3 + $0x4] ss:$16 sps:$4 sm:$0xff]   ;;  %v1392_v4 = vld [vmem:[#allocation3] ss:$16 sps:$4 sm:$0xff]   ;;  %v1666_v8 = vmov 3   ;;  %vm1226_vm0 = vcmask 57344  }
  0x38   :  { %89 = vperm.xlu0 %1385, %v73_v2   ;;  %131 = vperm.xlu1 %1387, %v73_v2   ;;  %v1393_v5 = vld [vmem:[#allocation3 + $0x24] ss:$16 sps:$4 sm:$0xff]   ;;  %v1395_v6 = vld [vmem:[#allocation3 + $0x20] ss:$16 sps:$4 sm:$0xff]   ;;  %v1440_v37 = vld [vmem:[#allocation3 + $0xc] ss:$16 sps:$4 sm:$0xff]  }
  0x39   :  { %580 = vmatprep.subr.bf16.mxu1 %v1390_v3  ;;  %v1396_v9 = vld [vmem:[#allocation3 + $0x44] ss:$16 sps:$4 sm:$0xff]   ;;  %v1398_v10 = vld [vmem:[#allocation3 + $0x40] ss:$16 sps:$4 sm:$0xff]   ;;  %v1757_v58 = vshrl.u32 %v76_v55, 7 }
  0x3a   :  { %581 = vmatpush1.bf16.msra.mxu1 %v1392_v4  ;;  %v1399_v11 = vld [vmem:[#allocation3 + $0x64] ss:$16 sps:$4 sm:$0xff]   ;;  %v1401_v12 = vld [vmem:[#allocation3 + $0x60] ss:$16 sps:$4 sm:$0xff]   ;;  %v1453_v55 = vld [vmem:[#allocation3 + $0xa8] ss:$16 sps:$4 sm:$0xff]  }
  0x3b   :  { %582 = vmatprep.subr.bf16.mxu1 %v1393_v5  ;;  %v1402_v13 = vld [vmem:[#allocation3 + $0x84] ss:$16 sps:$4 sm:$0xff]   ;;  %v1404_v14 = vld [vmem:[#allocation3 + $0x80] ss:$16 sps:$4 sm:$0xff]   ;;  %v1760_v61 = vsub.s32 0, %v1757_v58  ;;  %v1763_v62 = vsub.s32 1, %v1757_v58 }
  0x3c   :  { %1386 = vset.pattern.permute.xlu0 %v1665_v7  ;;  %1388 = vset.pattern.permute.xlu1 %v1666_v8  ;;  %v1405_v15 = vld [vmem:[#allocation3 + $0xa4] ss:$16 sps:$4 sm:$0xff]   ;;  %v1407_v16 = vld [vmem:[#allocation3 + $0xa0] ss:$16 sps:$4 sm:$0xff]  }
  0x3d   :  { %110 = vperm.xlu0 %1386, %v73_v2   ;;  %152 = vperm.xlu1 %1388, %v73_v2   ;;  %v1408_v17 = vld [vmem:[#allocation3 + $0xc4] ss:$16 sps:$4 sm:$0xff]   ;;  %v1410_v18 = vld [vmem:[#allocation3 + $0xc0] ss:$16 sps:$4 sm:$0xff]  }
  0x3e   :  { %583 = vmatpush1.bf16.msra.mxu1 %v1395_v6  ;;  %v1411_v19 = vld [vmem:[#allocation3 + $0xe4] ss:$16 sps:$4 sm:$0xff]   ;;  %v1413_v20 = vld [vmem:[#allocation3 + $0xe0] ss:$16 sps:$4 sm:$0xff]  }
  0x3f   :  { %584 = vmatprep.subr.bf16.mxu1 %v1396_v9  ;;  %v1414_v21 = vld [vmem:[#allocation3 + $0x104] ss:$16 sps:$4 sm:$0xff]   ;;  %v1416_v22 = vld [vmem:[#allocation3 + $0x100] ss:$16 sps:$4 sm:$0xff]  }
  0x40   :  { %v1417_v23 = vld [vmem:[#allocation3 + $0x124] ss:$16 sps:$4 sm:$0xff]   ;;  %v1419_v24 = vld [vmem:[#allocation3 + $0x120] ss:$16 sps:$4 sm:$0xff]  }
  0x41   :  { %1389 = vset.pattern.permute.xlu0 %v1666_v8  ;;  %v1420_v25 = vld [vmem:[#allocation3 + $0x144] ss:$16 sps:$4 sm:$0xff]   ;;  %v1422_v26 = vld [vmem:[#allocation3 + $0x140] ss:$16 sps:$4 sm:$0xff]  }
  0x42   :  { %585 = vmatpush1.bf16.msra.mxu1 %v1398_v10  ;;  %v1423_v27 = vld [vmem:[#allocation3 + $0x164] ss:$16 sps:$4 sm:$0xff]   ;;  %v1425_v28 = vld [vmem:[#allocation3 + $0x160] ss:$16 sps:$4 sm:$0xff]  }
  0x43   :  { %586 = vmatprep.subr.bf16.mxu1 %v1399_v11  ;;  %v1426_v29 = vld [vmem:[#allocation3 + $0x184] ss:$16 sps:$4 sm:$0xff]   ;;  %v1428_v30 = vld [vmem:[#allocation3 + $0x180] ss:$16 sps:$4 sm:$0xff]  }
  0x44   :  { %v1429_v31 = vld [vmem:[#allocation3 + $0x1a4] ss:$16 sps:$4 sm:$0xff]   ;;  %v1431_v32 = vld [vmem:[#allocation3 + $0x1a0] ss:$16 sps:$4 sm:$0xff]  }
  0x45   :  { %v1432_v33 = vld [vmem:[#allocation3 + $0x1c4] ss:$16 sps:$4 sm:$0xff]   ;;  %v1434_v34 = vld [vmem:[#allocation3 + $0x1c0] ss:$16 sps:$4 sm:$0xff]  }
  0x46   :  { %587 = vmatpush1.bf16.msra.mxu1 %v1401_v12  ;;  %v1435_v35 = vld [vmem:[#allocation3 + $0x1e4] ss:$16 sps:$4 sm:$0xff]   ;;  %v1437_v36 = vld [vmem:[#allocation3 + $0x1e0] ss:$16 sps:$4 sm:$0xff]  }
  0x47   :  { %588 = vmatprep.subr.bf16.mxu1 %v1402_v13  ;;  %v1486_v38 = vld [vmem:[#allocation5 + $0x4] ss:$8 sps:$4 sm:$0xff]   ;;  %v1488_v39 = vld [vmem:[#allocation5] ss:$8 sps:$4 sm:$0xff]   ;;  %v1489_v40 = vld [vmem:[#allocation5 + $0x14] ss:$8 sps:$4 sm:$0xff]  }
  0x48   :  { %1066 = vmatprep.subr.bf16.mxu0 %v1486_v38  ;;  %v1491_v41 = vld [vmem:[#allocation5 + $0x10] ss:$8 sps:$4 sm:$0xff]   ;;  %v1492_v42 = vld [vmem:[#allocation5 + $0x24] ss:$8 sps:$4 sm:$0xff]   ;;  %v1494_v43 = vld [vmem:[#allocation5 + $0x20] ss:$8 sps:$4 sm:$0xff]  }
  0x49   :  { %1067 = vmatpush1.bf16.msra.mxu0 %v1488_v39  ;;  %v1495_v44 = vld [vmem:[#allocation5 + $0x34] ss:$8 sps:$4 sm:$0xff]   ;;  %v1497_v45 = vld [vmem:[#allocation5 + $0x30] ss:$8 sps:$4 sm:$0xff]   ;;  %v1498_v46 = vld [vmem:[#allocation5 + $0x44] ss:$8 sps:$4 sm:$0xff]  }
  0x4a   :  { %589 = vmatpush1.bf16.msra.mxu1 %v1404_v14  ;;  %1068 = vmatprep.subr.bf16.mxu0 %v1489_v40  ;;  %v1500_v47 = vld [vmem:[#allocation5 + $0x40] ss:$8 sps:$4 sm:$0xff]   ;;  %v1501_v48 = vld [vmem:[#allocation5 + $0x54] ss:$8 sps:$4 sm:$0xff]   ;;  %v1503_v49 = vld [vmem:[#allocation5 + $0x50] ss:$8 sps:$4 sm:$0xff]  }
  0x4b   :  { %590 = vmatprep.subr.bf16.mxu1 %v1405_v15  ;;  %v1504_v50 = vld [vmem:[#allocation5 + $0x64] ss:$8 sps:$4 sm:$0xff]   ;;  %v1506_v51 = vld [vmem:[#allocation5 + $0x60] ss:$8 sps:$4 sm:$0xff]   ;;  %v1507_v52 = vld [vmem:[#allocation5 + $0x74] ss:$8 sps:$4 sm:$0xff]  }
  0x4c   :  { %v1509_v53 = vld [vmem:[#allocation5 + $0x70] ss:$8 sps:$4 sm:$0xff]   ;;  %v1510_v54 = vld [vmem:[#allocation5 + $0x84] ss:$8 sps:$4 sm:$0xff]   ;;  %v1512_v56 = vld [vmem:[#allocation5 + $0x80] ss:$8 sps:$4 sm:$0xff]  }
  0x4d   :  { %1069 = vmatpush1.bf16.msra.mxu0 %v1491_v41  ;;  %v1513_v57 = vld [vmem:[#allocation5 + $0x94] ss:$8 sps:$4 sm:$0xff]   ;;  %v1515_v59 = vld [vmem:[#allocation5 + $0x90] ss:$8 sps:$4 sm:$0xff]   ;;  %v1516_v60 = vld [vmem:[#allocation5 + $0xa4] ss:$8 sps:$4 sm:$0xff]  }
  0x4e   :  { %591 = vmatpush1.bf16.msra.mxu1 %v1407_v16  ;;  %1070 = vmatprep.subr.bf16.mxu0 %v1492_v42  ;;  %v1518_v63 = vld [vmem:[#allocation5 + $0xa0] ss:$8 sps:$4 sm:$0xff]   ;;  %v1519_v1 = vld [vmem:[#allocation5 + $0xb4] ss:$8 sps:$4 sm:$0xff]   ;;  %v1521_v5 = vld [vmem:[#allocation5 + $0xb0] ss:$8 sps:$4 sm:$0xff]  }
  0x4f   :  { %592 = vmatprep.subr.bf16.mxu1 %v1408_v17  ;;  %v86_v0 = vld [vmem:[%s1820_s1] ss:$4 sm:$0x3]  ;;  %v1234_v6 = vld [vmem:[%s1820_s1 + $0x1] ss:$4 sm:$0x3] }
  0x50   :  { %v74_v2 = vld [vmem:[%s1821_s2] sm:$0x3]  ;;  %v96_v3 = vrot.slane %v86_v0, %v1760_v61  ;;  %v100_v4 = vrot.slane %v86_v0, %v1763_v62  ;;  %v1522_v7 = vld [vmem:[#allocation5 + $0xc4] ss:$8 sps:$4 sm:$0xff]   ;;  %v117_v16 = vrot.slane %v1234_v6, %v1760_v61  ;;  %v121_v17 = vrot.slane %v1234_v6, %v1763_v62  ;;  %v1462_v0 = vld [vmem:[#allocation3 + $0x108] ss:$16 sps:$4 sm:$0xff]  }
  0x51   :  { %1071 = vmatpush1.bf16.msra.mxu0 %v1494_v43  ;;  %v1235_v9 = vld [vmem:[%s1820_s1 + $0x2] ss:$4 sm:$0x3]  ;;  %v79_v11 = vrot.slane %v74_v2, %v1760_v61  ;;  %v83_v12 = vrot.slane %v74_v2, %v1763_v62  ;;  %v1236_v13 = vld [vmem:[%s1820_s1 + $0x3] ss:$4 sm:$0x3] }
  0x52   :  { %593 = vmatpush1.bf16.msra.mxu1 %v1410_v18  ;;  %1072 = vmatprep.subr.bf16.mxu0 %v1495_v44  ;;  %v1524_v18 = vld [vmem:[#allocation5 + $0xc0] ss:$8 sps:$4 sm:$0xff]  }
  0x53   :  { %594 = vmatprep.subr.bf16.mxu1 %v1411_v19  ;;  %v138_v19 = vrot.slane %v1235_v9, %v1760_v61  ;;  %v1465_v2 = vld [vmem:[#allocation3 + $0x128] ss:$16 sps:$4 sm:$0xff]  }
  0x54   :  { %v1471_v6 = vld [vmem:[#allocation3 + $0x168] ss:$16 sps:$4 sm:$0xff]  }
  0x55   :  { %1073 = vmatpush1.bf16.msra.mxu0 %v1497_v45  ;;  %v1438_v45 = vld [vmem:[#allocation3 + $0x8] ss:$16 sps:$4 sm:$0xff]  }
  0x56   :  { %595 = vmatpush1.bf16.msra.mxu1 %v1413_v20  ;;  %1074 = vmatprep.subr.bf16.mxu0 %v1498_v46  ;;  %v142_v20 = vrot.slane %v1235_v9, %v1763_v62  ;;  %v1443_v46 = vld [vmem:[#allocation3 + $0x2c] ss:$16 sps:$4 sm:$0xff]  }
  0x57   :  { %596 = vmatprep.subr.bf16.mxu1 %v1414_v21  ;;  %v1525_v21 = vld [vmem:[#allocation5 + $0xd4] ss:$8 sps:$4 sm:$0xff]  }
  0x58   :  { %v1479_v9 = vld [vmem:[#allocation3 + $0x1ac] ss:$16 sps:$4 sm:$0xff]  }
  0x59   :  { %1075 = vmatpush1.bf16.msra.mxu0 %v1500_v47  ;;  %v1441_v47 = vld [vmem:[#allocation3 + $0x28] ss:$16 sps:$4 sm:$0xff]  }
  0x5a   :  { %597 = vmatpush1.bf16.msra.mxu1 %v1416_v22  ;;  %1076 = vmatprep.subr.bf16.mxu0 %v1501_v48  ;;  %v159_v22 = vrot.slane %v1236_v13, %v1760_v61  ;;  %v1446_v48 = vld [vmem:[#allocation3 + $0x4c] ss:$16 sps:$4 sm:$0xff]  }
  0x5b   :  { %598 = vmatprep.subr.bf16.mxu1 %v1417_v23  ;;  %v163_v23 = vrot.slane %v1236_v13, %v1763_v62  ;;  %v1485_v13 = vld [vmem:[#allocation3 + $0x1ec] ss:$16 sps:$4 sm:$0xff]  }
  0x5d   :  { %1077 = vmatpush1.bf16.msra.mxu0 %v1503_v49  ;;  %v1444_v49 = vld [vmem:[#allocation3 + $0x48] ss:$16 sps:$4 sm:$0xff]  }
  0x5e   :  { %599 = vmatpush1.bf16.msra.mxu1 %v1419_v24  ;;  %1078 = vmatprep.subr.bf16.mxu0 %v1504_v50  ;;  %v1449_v50 = vld [vmem:[#allocation3 + $0x6c] ss:$16 sps:$4 sm:$0xff]  }
  0x5f   :  { %600 = vmatprep.subr.bf16.mxu1 %v1420_v25 }
  0x61   :  { %1079 = vmatpush1.bf16.msra.mxu0 %v1506_v51  ;;  %v1447_v51 = vld [vmem:[#allocation3 + $0x68] ss:$16 sps:$4 sm:$0xff]  }
  0x62   :  { %601 = vmatpush1.bf16.msra.mxu1 %v1422_v26  ;;  %1080 = vmatprep.subr.bf16.mxu0 %v1507_v52  ;;  %v1452_v52 = vld [vmem:[#allocation3 + $0x8c] ss:$16 sps:$4 sm:$0xff]  }
  0x63   :  { %602 = vmatprep.subr.bf16.mxu1 %v1423_v27 }
  0x65   :  { %1081 = vmatpush1.bf16.msra.mxu0 %v1509_v53  ;;  %v1450_v53 = vld [vmem:[#allocation3 + $0x88] ss:$16 sps:$4 sm:$0xff]  }
  0x66   :  { %603 = vmatpush1.bf16.msra.mxu1 %v1425_v28  ;;  %1082 = vmatprep.subr.bf16.mxu0 %v1510_v54  ;;  %v1455_v54 = vld [vmem:[#allocation3 + $0xac] ss:$16 sps:$4 sm:$0xff]  }
  0x67   :  { %604 = vmatprep.subr.bf16.mxu1 %v1426_v29 }
  0x69   :  { %1083 = vmatpush1.bf16.msra.mxu0 %v1512_v56  ;;  %v1458_v56 = vld [vmem:[#allocation3 + $0xcc] ss:$16 sps:$4 sm:$0xff]  }
  0x6a   :  { %605 = vmatpush1.bf16.msra.mxu1 %v1428_v30  ;;  %1084 = vmatprep.subr.bf16.mxu0 %v1513_v57  ;;  %v1527_v30 = vld [vmem:[#allocation5 + $0xd0] ss:$8 sps:$4 sm:$0xff]  }
  0x6b   :  { %606 = vmatprep.subr.bf16.mxu1 %v1429_v31  ;;  %v1456_v57 = vld [vmem:[#allocation3 + $0xc8] ss:$16 sps:$4 sm:$0xff]  }
  0x6d   :  { %1085 = vmatpush1.bf16.msra.mxu0 %v1515_v59  ;;  %v1461_v59 = vld [vmem:[#allocation3 + $0xec] ss:$16 sps:$4 sm:$0xff]  }
  0x6e   :  { %607 = vmatpush1.bf16.msra.mxu1 %v1431_v32  ;;  %1086 = vmatprep.subr.bf16.mxu0 %v1516_v60  ;;  %v1459_v60 = vld [vmem:[#allocation3 + $0xe8] ss:$16 sps:$4 sm:$0xff]  }
  0x6f   :  { %608 = vmatprep.subr.bf16.mxu1 %v1432_v33 }
  0x71   :  { %1087 = vmatpush1.bf16.msra.mxu0 %v1518_v63  ;;  %v1464_v63 = vld [vmem:[#allocation3 + $0x10c] ss:$16 sps:$4 sm:$0xff]  }
  0x72   :  { %609 = vmatpush1.bf16.msra.mxu1 %v1434_v34  ;;  %1088 = vmatprep.subr.bf16.mxu0 %v1519_v1  ;;  %v1467_v1 = vld [vmem:[#allocation3 + $0x12c] ss:$16 sps:$4 sm:$0xff]  }
  0x73   :  { %610 = vmatprep.subr.bf16.mxu1 %v1435_v35 }
  0x75   :  { %1089 = vmatpush1.bf16.msra.mxu0 %v1521_v5  ;;  %v1473_v5 = vld [vmem:[#allocation3 + $0x16c] ss:$16 sps:$4 sm:$0xff]  }
  0x76   :  { %611 = vmatpush1.bf16.msra.mxu1 %v1437_v36  ;;  %1090 = vmatprep.subr.bf16.mxu0 %v1522_v7  ;;  %v1476_v7 = vld [vmem:[#allocation3 + $0x18c] ss:$16 sps:$4 sm:$0xff]  }
  0x77   :  { %621 = vmatprep.subr.bf16.mxu1 %v1440_v37 }
  0x79   :  { %1091 = vmatpush1.bf16.msra.mxu0 %v1524_v18  ;;  %v1533_v18 = vld [vmem:[#allocation5 + $0xf0] ss:$8 sps:$4 sm:$0xff]  }
  0x7a   :  { %1092 = vmatprep.subr.bf16.mxu0 %v1525_v21 }
  0x7d   :  { %1093 = vmatpush1.bf16.msra.mxu0 %v1527_v30 }
  0xb7   :  { %v90_v8 = vpop.permute.xlu0 %89  ;;  %v132_v10 = vpop.permute.xlu1 %131 }
  0xb8   :  { %v103_v14 = vmul.f32 %v96_v3, %v90_v8  ;;  %v104_v15 = vmul.f32 %v100_v4, %v90_v8  ;;  %v145_v31 = vmul.f32 %v138_v19, %v132_v10  ;;  %v146_v32 = vmul.f32 %v142_v20, %v132_v10  ;;  %v1470_v3 = vld [vmem:[#allocation3 + $0x14c] ss:$16 sps:$4 sm:$0xff]   ;;  %v1468_v4 = vld [vmem:[#allocation3 + $0x148] ss:$16 sps:$4 sm:$0xff]   ;;  %v1797_v20 = vld [vmem:[%s1823_s4] sm:$0xf] }
  0xb9   :  { %v1474_v8 = vld [vmem:[#allocation3 + $0x188] ss:$16 sps:$4 sm:$0xff]   ;;  %v1536_v19 = vld [vmem:[#allocation5 + $0x104] ss:$8 sps:$4 sm:$0xff]   ;;  %v243_v21 = vrot.slane %v1797_v20, %v1760_v61 }
  0xba   :  { %v105_v26 = vadd.f32 %v103_v14, %v79_v11  ;;  %v106_v27 = vadd.f32 %v104_v15, %v83_v12  ;;  %v1477_v10 = vld [vmem:[#allocation3 + $0x1a8] ss:$16 sps:$4 sm:$0xff]   ;;  %v1482_v11 = vld [vmem:[#allocation3 + $0x1cc] ss:$16 sps:$4 sm:$0xff]  }
  0xbb   :  { %v1480_v12 = vld [vmem:[#allocation3 + $0x1c8] ss:$16 sps:$4 sm:$0xff]   ;;  %v1528_v15 = vld [vmem:[#allocation5 + $0xe4] ss:$8 sps:$4 sm:$0xff]  }
  0xbc   :  { %v111_v24 = vpop.permute.xlu0 %110  ;;  %v153_v25 = vpop.permute.xlu1 %152  ;;  %v1483_v14 = vld [vmem:[#allocation3 + $0x1e8] ss:$16 sps:$4 sm:$0xff]   ;;  %1094 = vmatprep.subr.bf16.mxu0 %v1528_v15 }
  0xbd   :  { %v124_v28 = vmul.f32 %v117_v16, %v111_v24  ;;  %v125_v29 = vmul.f32 %v121_v17, %v111_v24  ;;  %v166_v35 = vmul.f32 %v159_v22, %v153_v25  ;;  %v167_v36 = vmul.f32 %v163_v23, %v153_v25  ;;  %v1530_v16 = vld [vmem:[#allocation5 + $0xe0] ss:$8 sps:$4 sm:$0xff]   ;;  %v1531_v17 = vld [vmem:[#allocation5 + $0xf4] ss:$8 sps:$4 sm:$0xff]  }
  0xbe   :  { %1095 = vmatpush1.bf16.msra.mxu0 %v1530_v16  ;;  %v247_v22 = vrot.slane %v1797_v20, %v1763_v62 }
  0xbf   :  { %v126_v33 = vadd.f32 %v124_v28, %v105_v26  ;;  %v127_v34 = vadd.f32 %v125_v29, %v106_v27  ;;  %1096 = vmatprep.subr.bf16.mxu0 %v1531_v17  ;;  %v1667_v17 = vmov 1966171168  }
  0xc1   :  { %v147_v37 = vadd.f32 %v145_v31, %v126_v33  ;;  %v148_v38 = vadd.f32 %v146_v32, %v127_v34  ;;  %v1534_v32 = vld [vmem:[#allocation5 + $0x100] ss:$8 sps:$4 sm:$0xff]   ;;  %v1539_v34 = vld [vmem:[#allocation5 + $0x114] ss:$8 sps:$4 sm:$0xff]  }
  0xc2   :  { %1097 = vmatpush1.bf16.msra.mxu0 %v1533_v18  ;;  %v1165_v18 = vunpack.c.l.s4 %v1667_v17 }
  0xc3   :  { %v168_v39 = vadd.f32 %v166_v35, %v147_v37  ;;  %v169_v40 = vadd.f32 %v167_v36, %v148_v38  ;;  %1107 = vmatprep.subr.bf16.mxu0 %v1536_v19  ;;  %v1537_v35 = vld [vmem:[#allocation5 + $0x110] ss:$8 sps:$4 sm:$0xff]   ;;  %v1542_v36 = vld [vmem:[#allocation5 + $0x124] ss:$8 sps:$4 sm:$0xff]   ;;  %v1540_v37 = vld [vmem:[#allocation5 + $0x120] ss:$8 sps:$4 sm:$0xff]  }
  0xc4   :  { %v1545_v38 = vld [vmem:[#allocation5 + $0x134] ss:$8 sps:$4 sm:$0xff]   ;;  %v1365_v19 = vld.sshfl [vmem:[#allocation7] sm:$0x11 pattern:$0x75316420] }
  0xc5   :  { %v170_v41 = vmax.f32 %v168_v39, 0.0  ;;  %v171_v42 = vmax.f32 %v169_v40, 0.0  ;;  %v1543_v39 = vld [vmem:[#allocation5 + $0x130] ss:$8 sps:$4 sm:$0xff]   ;;  %v1548_v40 = vld [vmem:[#allocation5 + $0x144] ss:$8 sps:$4 sm:$0xff]  }
  0xc7   :  { %v1790_v43 = vpack.c.bf16 %v170_v41, %v170_v41  ;;  %v173_v44 = vpack.c.bf16 %v171_v42, %v171_v42  ;;  %v1546_v41 = vld [vmem:[#allocation5 + $0x140] ss:$8 sps:$4 sm:$0xff]   ;;  %v1551_v42 = vld [vmem:[#allocation5 + $0x154] ss:$8 sps:$4 sm:$0xff]  }
  0xc9   :  { %612 = vmatprep.mubr.bf16.mxu1 %v173_v44 }
  0xca   :  { %613 = vmatmul.mubr.bf16.vlgmr.msra.gmra.mrb[0].mxu1 %v1790_v43 }
  0xcb   :  { %622 = vmatpush1.bf16.msra.mxu1 %v1438_v45  ;;  %653 = vmatprep.mubr.bf16.mxu1 %v173_v44  ;;  %v1554_v44 = vld [vmem:[#allocation5 + $0x164] ss:$8 sps:$4 sm:$0xff]   ;;  %v1552_v45 = vld [vmem:[#allocation5 + $0x160] ss:$8 sps:$4 sm:$0xff]  }
  0xcc   :  { %623 = vmatprep.subr.bf16.mxu1 %v1443_v46  ;;  %v1557_v46 = vld [vmem:[#allocation5 + $0x174] ss:$8 sps:$4 sm:$0xff]  }
  0xcf   :  { %624 = vmatpush1.bf16.msra.mxu1 %v1441_v47  ;;  %v1555_v47 = vld [vmem:[#allocation5 + $0x170] ss:$8 sps:$4 sm:$0xff]  }
  0xd0   :  { %625 = vmatprep.subr.bf16.mxu1 %v1446_v48  ;;  %v1560_v48 = vld [vmem:[#allocation5 + $0x184] ss:$8 sps:$4 sm:$0xff]  }
  0xd3   :  { %626 = vmatpush1.bf16.msra.mxu1 %v1444_v49  ;;  %v1558_v49 = vld [vmem:[#allocation5 + $0x180] ss:$8 sps:$4 sm:$0xff]  }
  0xd4   :  { %627 = vmatprep.subr.bf16.mxu1 %v1449_v50  ;;  %v1563_v50 = vld [vmem:[#allocation5 + $0x194] ss:$8 sps:$4 sm:$0xff]  }
  0xd7   :  { %628 = vmatpush1.bf16.msra.mxu1 %v1447_v51  ;;  %v1561_v51 = vld [vmem:[#allocation5 + $0x190] ss:$8 sps:$4 sm:$0xff]  }
  0xd8   :  { %629 = vmatprep.subr.bf16.mxu1 %v1452_v52  ;;  %v1566_v52 = vld [vmem:[#allocation5 + $0x1a4] ss:$8 sps:$4 sm:$0xff]  }
  0xdb   :  { %630 = vmatpush1.bf16.msra.mxu1 %v1450_v53  ;;  %v1564_v53 = vld [vmem:[#allocation5 + $0x1a0] ss:$8 sps:$4 sm:$0xff]  }
  0xdc   :  { %631 = vmatprep.subr.bf16.mxu1 %v1455_v54  ;;  %v1569_v54 = vld [vmem:[#allocation5 + $0x1b4] ss:$8 sps:$4 sm:$0xff]  }
  0xdf   :  { %632 = vmatpush1.bf16.msra.mxu1 %v1453_v55  ;;  %v1567_v55 = vld [vmem:[#allocation5 + $0x1b0] ss:$8 sps:$4 sm:$0xff]  }
  0xe0   :  { %633 = vmatprep.subr.bf16.mxu1 %v1458_v56  ;;  %v1572_v56 = vld [vmem:[#allocation5 + $0x1c4] ss:$8 sps:$4 sm:$0xff]  }
  0xe3   :  { %634 = vmatpush1.bf16.msra.mxu1 %v1456_v57  ;;  %v1570_v57 = vld [vmem:[#allocation5 + $0x1c0] ss:$8 sps:$4 sm:$0xff]  }
  0xe4   :  { %635 = vmatprep.subr.bf16.mxu1 %v1461_v59  ;;  %v1575_v59 = vld [vmem:[#allocation5 + $0x1d4] ss:$8 sps:$4 sm:$0xff]  }
  0xe7   :  { %636 = vmatpush1.bf16.msra.mxu1 %v1459_v60  ;;  %v250_v60 = vsub.s32 2, %v1757_v58 }
  0xe8   :  { %637 = vmatprep.subr.bf16.mxu1 %v1464_v63  ;;  %v1573_v63 = vld [vmem:[#allocation5 + $0x1d0] ss:$8 sps:$4 sm:$0xff]  }
  0xeb   :  { %638 = vmatpush1.bf16.msra.mxu1 %v1462_v0  ;;  %v254_v0 = vsub.s32 3, %v1757_v58 }
  0xec   :  { %639 = vmatprep.subr.bf16.mxu1 %v1467_v1  ;;  %v1578_v1 = vld [vmem:[#allocation5 + $0x1e4] ss:$8 sps:$4 sm:$0xff]  }
  0xef   :  { %640 = vmatpush1.bf16.msra.mxu1 %v1465_v2  ;;  %v251_v2 = vrot.slane %v1797_v20, %v250_v60 }
  0xf0   :  { %641 = vmatprep.subr.bf16.mxu1 %v1470_v3  ;;  %v255_v3 = vrot.slane %v1797_v20, %v254_v0  ;;  %v1166_v20 = vunpack.c.0.s8 %v1165_v18 }
  0xf3   :  { %642 = vmatpush1.bf16.msra.mxu1 %v1468_v4  ;;  %v1576_v4 = vld [vmem:[#allocation5 + $0x1e0] ss:$8 sps:$4 sm:$0xff]  }
  0xf4   :  { %643 = vmatprep.subr.bf16.mxu1 %v1473_v5  ;;  %v1581_v5 = vld [vmem:[#allocation5 + $0x1f4] ss:$8 sps:$4 sm:$0xff]  }
  0xf7   :  { %644 = vmatpush1.bf16.msra.mxu1 %v1471_v6 }
  0xf8   :  { %645 = vmatprep.subr.bf16.mxu1 %v1476_v7 }
  0xfb   :  { %646 = vmatpush1.bf16.msra.mxu1 %v1474_v8 }
  0xfc   :  { %647 = vmatprep.subr.bf16.mxu1 %v1479_v9 }
  0xff   :  { %648 = vmatpush1.bf16.msra.mxu1 %v1477_v10 }
 0x100   :  { %649 = vmatprep.subr.bf16.mxu1 %v1482_v11  ;;  %v1579_v11 = vld [vmem:[#allocation5 + $0x1f0] ss:$8 sps:$4 sm:$0xff]  }
 0x103   :  { %650 = vmatpush1.bf16.msra.mxu1 %v1480_v12 }
 0x104   :  { %651 = vmatprep.subr.bf16.mxu1 %v1485_v13 }
 0x107   :  { %652 = vmatpush1.bf16.msra.mxu1 %v1483_v14 }
 0x10a   :  { %654 = vmatmul.mubr.bf16.vlgmr.msra.gmra.mrb[4].mxu1 %v1790_v43  ;;  %v1549_v43 = vld [vmem:[#allocation5 + $0x150] ss:$8 sps:$4 sm:$0xff]  }
 0x19d   :  { %v614_v23 = vpop.f32.mrb[0].mxu1 }
 0x19e   :  { %v615_v24 = vadd.f32 %v614_v23, %v243_v21  ;;  %v616_v25 = vpop.f32.mrb[1].mxu1  ;;  %v1163_v21 = vcombine.high %v1365_v19, %v1365_v19 }
 0x19f   :  { %v617_v26 = vadd.f32 %v616_v25, %v247_v22  ;;  %v618_v27 = vpop.f32.mrb[2].mxu1  ;;  %v1169_v22 = vsub.s32 %v1166_v20, %v1757_v58  ;;  %v734_v25 = vld [vmem:[%s1825_s6] sm:$0x3] }
 0x1a0   :  { %v662_v28 = vmax.f32 %v615_v24, 0.0  ;;  %v619_v29 = vpop.f32.mrb[3].mxu1  ;;  %v743_v27 = vrot.slane %v734_v25, %v1763_v62 }
 0x1a1   :  { %v663_v30 = vmax.f32 %v617_v26, 0.0  ;;  %v1177_v23 = vrot.slane %v1163_v21, %v1169_v22  ;;  %v1170_v24 = vrot.slane %v1365_v19, %v1169_v22  ;;  %v739_v26 = vrot.slane %v734_v25, %v1760_v61 }
 0x1a2   :  { %v666_v33 = vpack.c.bf16 %v662_v28, %v662_v28 }
 0x1a3   :  { %v667_v31 = vpack.c.bf16 %v663_v30, %v663_v30  ;;  %1212 = vmatprep.mubr.bf16.mxu1 %v1177_v23 }
 0x1a5   :  { %1098 = vmatprep.mubr.bf16.mxu0 %v667_v31 }
 0x1a6   :  { %1099 = vmatmul.mubr.bf16.vlgmr.msra.gmra.mrb[0].mxu0 %v666_v33 }
 0x1a7   :  { %1108 = vmatpush1.bf16.msra.mxu0 %v1534_v32 }
 0x1a8   :  { %1109 = vmatprep.subr.bf16.mxu0 %v1539_v34 }
 0x1ab   :  { %1110 = vmatpush1.bf16.msra.mxu0 %v1537_v35 }
 0x1ac   :  { %1111 = vmatprep.subr.bf16.mxu0 %v1542_v36 }
 0x1af   :  { %1112 = vmatpush1.bf16.msra.mxu0 %v1540_v37  ;;  %v1154_v37 = vstv %s1827_s8 }
 0x1b0   :  { %1113 = vmatprep.subr.bf16.mxu0 %v1545_v38 }
 0x1b3   :  { %1114 = vmatpush1.bf16.msra.mxu0 %v1543_v39 }
 0x1b4   :  { %1115 = vmatprep.subr.bf16.mxu0 %v1548_v40 }
 0x1b7   :  { %1116 = vmatpush1.bf16.msra.mxu0 %v1546_v41 }
 0x1b8   :  { %1117 = vmatprep.subr.bf16.mxu0 %v1551_v42 }
 0x1bb   :  { %1118 = vmatpush1.bf16.msra.mxu0 %v1549_v43 }
 0x1bc   :  { %1119 = vmatprep.subr.bf16.mxu0 %v1554_v44 }
 0x1bf   :  { %1120 = vmatpush1.bf16.msra.mxu0 %v1552_v45 }
 0x1c0   :  { %1121 = vmatprep.subr.bf16.mxu0 %v1557_v46 }
 0x1c3   :  { %1122 = vmatpush1.bf16.msra.mxu0 %v1555_v47 }
 0x1c4   :  { %1123 = vmatprep.subr.bf16.mxu0 %v1560_v48 }
 0x1c7   :  { %1124 = vmatpush1.bf16.msra.mxu0 %v1558_v49 }
 0x1c8   :  { %1125 = vmatprep.subr.bf16.mxu0 %v1563_v50 }
 0x1cb   :  { %1126 = vmatpush1.bf16.msra.mxu0 %v1561_v51 }
 0x1cc   :  { %1127 = vmatprep.subr.bf16.mxu0 %v1566_v52 }
 0x1cf   :  { %1128 = vmatpush1.bf16.msra.mxu0 %v1564_v53 }
 0x1d0   :  { %1129 = vmatprep.subr.bf16.mxu0 %v1569_v54 }
 0x1d3   :  { %1130 = vmatpush1.bf16.msra.mxu0 %v1567_v55 }
 0x1d4   :  { %1131 = vmatprep.subr.bf16.mxu0 %v1572_v56 }
 0x1d7   :  { %1132 = vmatpush1.bf16.msra.mxu0 %v1570_v57 }
 0x1d8   :  { %1133 = vmatprep.subr.bf16.mxu0 %v1575_v59 }
 0x1db   :  { %1134 = vmatpush1.bf16.msra.mxu0 %v1573_v63 }
 0x1dc   :  { %1135 = vmatprep.subr.bf16.mxu0 %v1578_v1 }
 0x1dd   :  { %v655_v6 = vpop.f32.mrb[4].mxu1 }
 0x1de   :  { %v656_v7 = vadd.f32 %v655_v6, %v251_v2  ;;  %v657_v8 = vpop.f32.mrb[5].mxu1 }
 0x1df   :  { %v658_v9 = vadd.f32 %v657_v8, %v255_v3  ;;  %v659_v10 = vpop.f32.mrb[6].mxu1  ;;  %1136 = vmatpush1.bf16.msra.mxu0 %v1576_v4 }
 0x1e0   :  { %v664_v12 = vmax.f32 %v656_v7, 0.0  ;;  %v660_v13 = vpop.f32.mrb[7].mxu1  ;;  %1137 = vmatprep.subr.bf16.mxu0 %v1581_v5 }
 0x1e1   :  { %v665_v14 = vmax.f32 %v658_v9, 0.0 }
 0x1e2   :  { %v668_v16 = vpack.c.bf16 %v664_v12, %v664_v12 }
 0x1e3   :  { %v669_v15 = vpack.c.bf16 %v665_v14, %v665_v14  ;;  %1138 = vmatpush1.bf16.msra.mxu0 %v1579_v11 }
 0x1e5   :  { %1139 = vmatprep.mubr.bf16.mxu0 %v669_v15 }
 0x1e6   :  { %1140 = vmatmul.mubr.bf16.vlgmr.msra.gmra.mrb[0].mxu0 %v668_v16 }
 0x2b9   :  { %v1141_v28 = vpop.f32.mrb[0].mxu0 }
 0x2ba   :  { %v1367_v29 = vadd.f32 %v1141_v28, %v739_v26  ;;  %v1143_v30 = vpop.f32.mrb[1].mxu0 }
 0x2bb   :  { %v1368_v31 = vadd.f32 %v1143_v30, %v743_v27  ;;  %v1145_v32 = vpop.f32.mrb[2].mxu0 }
 0x2bc   :  { %v1148_v33 = vmax.f32 %v1367_v29, 0.0  ;;  %v1146_v34 = vpop.f32.mrb[3].mxu0 }
 0x2bd   :  { %v1149_v35 = vmax.f32 %v1368_v31, 0.0 }
 0x2be   :  { %v1151_v36 = vpack.c.bf16 %v1148_v33, %v1148_v33 }
 0x2bf   :  { %v1152_v58 = vpack.c.bf16 %v1149_v35, %v1149_v35 }
 0x2c1   :  { %1180 = vmatprep.subr.bf16.mxu1 %v1152_v58 }
 0x2c2   :  { %1181 = vmatpush1.bf16.xpose.msra.mxu1 %v1151_v36 }
 0x2c9   :  { %1213 = vmatmul.mubr.bf16.vlgmr.msra.gmra.mrb[8].mxu1 %v1170_v24 }
 0x39c   :  { %v1214_v61 = vpop.f32.mrb[8].mxu1 }
 0x39d   :  { %v1215_v38 = vadd.f32 %v1214_v61, %v1154_v37  ;;  %v1216_v62 = vpop.f32.mrb[9].mxu1 }
 0x39e   :  { %v1217_v39 = vpop.f32.mrb[10].mxu1 }
 0x39f   :  { %v1366_v40 = vmul.f32 -1.442695, %v1215_v38  ;;  %v1218_v41 = vpop.f32.mrb[11].mxu1 }
 0x3a1   :  { %1582 = vpow2.f32 %v1366_v40 }
 0x3ab   :  { %v1583_v42 = vpop.eup %1582 }
 0x3ac   :  { %v1223_v43 = vadd.f32 1.0, %v1583_v42 }
 0x3ae   :  { %1584 = vrcp.f32 %v1223_v43 }
 0x3b8   :  { %v1585_v44 = vpop.eup %1584 }
 0x3b9   :  { %1227 = vst.msk [vmem:[%s1828_s9] sm:$0x1] %vm1226_vm0, %v1585_v44 }
 0x3ba   :  { %1232 = vsyncpa [#allocation4], 1 }
 0x3bb   :  { %1233 = vsyncpa [#allocation6], 1 }

</bundles_post_ra>
